<compile_context>
chip_gen: v7x
topology: tpu7x:2x2x1
jax: 0.10.0
libtpu: 0.0.40
codegen_flags: <defaults>
</compile_context>

<pallas_src>
import functools
import numpy as np
import jax
import jax.numpy as jnp
from jax.experimental import pallas as pl
from jax.experimental.pallas import tpu as pltpu

TIMESTEPS = 2000          # module default
OBJECTIVE = "pred_noise"  # module default

MAX_LANE_TILE = 32768               # ~24 MiB live VMEM per step at this tile -> safe on v7x/v6e/v5e
VMEM_LIMIT_BYTES = 48 * 1024 * 1024 # <= v7x 64 MiB/TC minus Mosaic scratch headroom; raises v5e's 16 MiB default


# ---------------------------------------------------------------------------
# Schedule buffers (float64 in numpy, registered as float32 — matches module)
# ---------------------------------------------------------------------------
def sigmoid_beta_schedule_np(timesteps, start=-3.0, end=3.0, tau=1.0):
    steps = timesteps + 1
    t = np.linspace(0, timesteps, steps, dtype=np.float64) / timesteps
    sig = lambda z: 1.0 / (1.0 + np.exp(-z))
    v_start = sig(start / tau)
    v_end = sig(end / tau)
    ac = (-sig((t * (end - start) + start) / tau) + v_end) / (v_end - v_start)
    ac = ac / ac[0]
    betas = 1.0 - ac[1:] / ac[:-1]
    return np.clip(betas, 0.0, 0.999)


def make_schedule_buffers(timesteps=TIMESTEPS):
    betas = sigmoid_beta_schedule_np(timesteps)
    alphas = 1.0 - betas
    alphas_cumprod = np.cumprod(alphas)
    sqrt_ac = np.sqrt(alphas_cumprod)
    sqrt_omac = np.sqrt(1.0 - alphas_cumprod)
    snr = alphas_cumprod / (1.0 - alphas_cumprod)
    # objective == 'pred_noise', min_snr_loss_weight == False -> weight = snr / snr == 1
    loss_weight = snr / snr
    return {
        "sqrt_alphas_cumprod": jnp.asarray(sqrt_ac, jnp.float32),
        "sqrt_one_minus_alphas_cumprod": jnp.asarray(sqrt_omac, jnp.float32),
        "loss_weight": jnp.asarray(loss_weight, jnp.float32),
    }


# ---------------------------------------------------------------------------
# Pallas kernel: q_sample + denoiser + per-batch weighted mean-squared-error.
# Per grid step it sees one (C, TS) lane tile of one batch element.
# ---------------------------------------------------------------------------
def diffusion_kernel(sched_ref,                       # (4, B) f32 SMEM: [sqrt_ac; sqrt_omac; lw; t_norm]
                     x0_ref, noise_ref, cond_ref,     # (C, TS) f32 VMEM tiles
                     w_in_ref, bt_ref, w2_ref, b2_ref,  # packed resident VMEM weights
                     out_ref, loss_ref,               # (C, TS), (1, 1)
                     *, lane_tile, valid_s, inv_count, needs_mask):
    b = pl.program_id(0)      # batch index       ("parallel")
    si = pl.program_id(1)     # lane-tile index   ("arbitrary" -> loss reduction axis, kept last)

    sqrt_ac = sched_ref[0, b]    # scalar reads from SMEM (extract(...) results)
    sqrt_omac = sched_ref[1, b]
    lw = sched_ref[2, b]
    tn = sched_ref[3, b]

    x0 = x0_ref[...]          # (C, TS)
    noise = noise_ref[...]    # (C, TS)
    cond = cond_ref[...]      # (C, TS)

    # q_sample: x_t = sqrt(ac[t]) * x0 + sqrt(1 - ac[t]) * noise
    x_t = sqrt_ac * x0 + sqrt_omac * noise

    # fused K=2C matmul: [w1 | wc] @ [x_t ; cond]   (sublane concat is XLU-cheap)
    xin = jnp.concatenate([x_t, cond], axis=0)                                # (2C, TS)
    h = jnp.dot(w_in_ref[...], xin, preferred_element_type=jnp.float32)       # (HID, TS)

    # folded bias + time embedding: one (HID,1) vector -> single full-width add
    bvec = bt_ref[:, 0:1] + bt_ref[:, 1:2] * tn                               # (HID, 1)
    h = h + bvec

    # SiLU via EUP (exp + approx reciprocal occupy the EUP slot, off the VALU critical path)
    h = h * pl.reciprocal(1.0 + jnp.exp(-h), approx=True)

    out = jnp.dot(w2_ref[...], h, preferred_element_type=jnp.float32) + b2_ref[...]  # (C, TS)
    out_ref[...] = out

    # per-batch weighted mean-squared-error, accumulated across lane tiles.
    # (target == noise for objective='pred_noise' -> not written out; wrapper reuses noise.)
    @pl.when(si == 0)
    def _():
        loss_ref[...] = jnp.zeros_like(loss_ref)

    diff = out - noise
    sq = diff * diff
    if needs_mask:
        lane = jax.lax.broadcasted_iota(jnp.int32, (1, lane_tile), 1) + si * lane_tile
        sq = jnp.where(lane < valid_s, sq, 0.0)
    s1 = jnp.sum(sq, axis=1, keepdims=True)    # (C, 1)
    s2 = jnp.sum(s1, axis=0, keepdims=True)    # (1, 1)
    # scale by 1/(C*S) here so the accumulator stays O(1) across many tiles (mean-of-means style)
    loss_ref[...] += (lw * inv_count) * s2


def _round_up(x, m):
    return ((x + m - 1) // m) * m


def _choose_tiling(S, max_lanes=MAX_LANE_TILE):
    """Return (TS, S_pad): TS a multiple of 128 (<= max_lanes), S_pad a multiple of TS."""
    s128 = _round_up(S, 128)
    if s128 <= max_lanes:
        return s128, s128
    # try the largest 128-multiple divisor of s128 that fits the cap
    ts = (max_lanes // 128) * 128
    while ts >= 128:
        if s128 % ts == 0:
            break
        ts -= 128
    if ts >= 8 * 1024:   # big enough to amortize the ~0.35us per-grid-step overhead
        return ts, s128
    # otherwise pad up to a multiple of the cap (bounded extra traffic, full unmasked tiles)
    return max_lanes, _round_up(S, max_lanes)


# ---------------------------------------------------------------------------
# Wrapper (glue): RNG, schedule gathers (extract), free reshapes, loss finalize.
# ---------------------------------------------------------------------------
def gaussian_diffusion_forward(params, schedules, img, condition, key):
    B, C, H, W = img.shape
    S = H * W

    k_t, k_noise = jax.random.split(key)
    t = jax.random.randint(k_t, (B,), 0, TIMESTEPS)                   # torch.randint
    noise = jax.random.normal(k_noise, img.shape, dtype=jnp.float32)  # torch.randn_like

    # extract(buf, t, x.shape): per-batch gather -> packed (4, B) SMEM array
    sqrt_ac = schedules["sqrt_alphas_cumprod"][t]
    sqrt_omac = schedules["sqrt_one_minus_alphas_cumprod"][t]
    lw = schedules["loss_weight"][t]
    t_norm = t.astype(jnp.float32) / float(TIMESTEPS)                 # time-embedding input
    sched = jnp.stack([sqrt_ac, sqrt_omac, lw, t_norm], axis=0)       # (4, B) f32

    # contiguous (free) reshape — no transposes
    x0 = img.reshape(B, C, S)
    nz = noise.reshape(B, C, S)
    cd = condition.reshape(B, C, S)

    TS, S_pad = _choose_tiling(S)
    if S_pad != S:
        pad = ((0, 0), (0, 0), (0, S_pad - S))
        x0 = jnp.pad(x0, pad)
        nz = jnp.pad(nz, pad)
        cd = jnp.pad(cd, pad)
    needs_mask = (S_pad != S)
    grid = (B, S_pad // TS)
    inv_count = 1.0 / float(C * S)

    kernel = functools.partial(diffusion_kernel, lane_tile=TS, valid_s=S,
                               inv_count=inv_count, needs_mask=needs_mask)

    tile_spec = lambda: pl.BlockSpec((None, C, TS), lambda b, s: (b, 0, s))
    vmem_spec = lambda: pl.BlockSpec(memory_space=pltpu.MemorySpace.VMEM)
    smem_spec = pl.BlockSpec(memory_space=pltpu.MemorySpace.SMEM)

    out3d, loss_part = pl.pallas_call(
        kernel,
        grid=grid,
        in_specs=[
            smem_spec,                               # packed per-batch schedule scalars
            tile_spec(), tile_spec(), tile_spec(),   # x0, noise, condition tiles
            vmem_spec(), vmem_spec(), vmem_spec(), vmem_spec(),  # w_in, bt, w2, b2 (resident)
        ],
        out_specs=(
            tile_spec(),                                          # model_out tiles
            pl.BlockSpec((None, 1, 1), lambda b, s: (b, 0, 0)),   # per-batch loss accumulator
        ),
        out_shape=(
            jax.ShapeDtypeStruct((B, C, S_pad), jnp.float32),
            jax.ShapeDtypeStruct((B, 1, 1), jnp.float32),
        ),
        compiler_params=pltpu.CompilerParams(
            dimension_semantics=("parallel", "arbitrary"),
            vmem_limit_bytes=VMEM_LIMIT_BYTES),
    )(sched, x0, nz, cd,
      params["w_in"], params["bt"], params["w2"], params["b2"])

    model_out = out3d[:, :, :S].reshape(B, C, H, W)
    target = noise  # objective == 'pred_noise' => target is exactly the input noise (no extra HBM write)

    # per-batch loss_b = lw_b * mean_chw(sq) already formed in-kernel; final = mean_b(loss_b)
    loss = jnp.mean(loss_part.reshape(B))
    return loss, model_out, target


def init_params(key, channels=4, hidden=32):
    ks = jax.random.split(key, 4)
    w1 = 0.1 * jax.random.normal(ks[0], (hidden, channels), jnp.float32)
    wc = 0.1 * jax.random.normal(ks[1], (hidden, channels), jnp.float32)
    tproj = 0.1 * jax.random.normal(ks[2], (hidden, 1), jnp.float32)
    w2 = 0.1 * jax.random.normal(ks[3], (channels, hidden), jnp.float32)
    b1 = jnp.zeros((hidden, 1), jnp.float32)
    b2 = jnp.zeros((channels, 1), jnp.float32)
    return {
        "w_in": jnp.concatenate([w1, wc], axis=1),    # (HID, 2C) fused input/condition mix
        "bt": jnp.concatenate([b1, tproj], axis=1),   # (HID, 2)  [bias | time-projection]
        "w2": w2,                                     # (C, HID)
        "b2": b2,                                     # (C, 1)
    }


if __name__ == "__main__":
    key = jax.random.PRNGKey(0)
    k_img, k_cond, k_fwd, k_param = jax.random.split(key, 4)

    B, C, H, W = 2, 4, 16, 16
    img = jax.random.normal(k_img, (B, C, H, W), dtype=jnp.float32)
    condition = jax.random.normal(k_cond, (B, C, H, W), dtype=jnp.float32)

    schedules = make_schedule_buffers()
    params = init_params(k_param, channels=C, hidden=32)

    loss, model_out, target = gaussian_diffusion_forward(params, schedules, img, condition, k_fwd)
    jax.block_until_ready((loss, model_out, target))

    assert model_out.shape == (B, C, H, W)
    assert target.shape == (B, C, H, W)
    assert loss.shape == ()
    assert bool(jnp.isfinite(loss))

    # consistency check: for this config loss_weight == 1, so loss == plain MSE(model_out, target)
    ref_loss = jnp.mean((model_out - target) ** 2)
    assert bool(jnp.allclose(loss, ref_loss, rtol=1e-4, atol=1e-6)), (loss, ref_loss)

    print("KERNEL_OK")
</pallas_src>

<mosaic_0001>
module attributes {stable_mosaic.version = 11 : i64} {
  func.func @diffusion_kernel(%arg0: i32, %arg1: i32, %arg2: memref<4x2xf32, #tpu.memory_space<smem>>, %arg3: memref<1x4x256xf32, #tpu.memory_space<vmem>>, %arg4: memref<1x4x256xf32, #tpu.memory_space<vmem>>, %arg5: memref<1x4x256xf32, #tpu.memory_space<vmem>>, %arg6: memref<32x8xf32, #tpu.memory_space<vmem>>, %arg7: memref<32x2xf32, #tpu.memory_space<vmem>>, %arg8: memref<4x32xf32, #tpu.memory_space<vmem>>, %arg9: memref<4x1xf32, #tpu.memory_space<vmem>>, %arg10: memref<1x4x256xf32, #tpu.memory_space<vmem>>, %arg11: memref<1x1x1xf32, #tpu.memory_space<vmem>>) attributes {dimension_semantics = [#tpu.dimension_semantics<parallel>, #tpu.dimension_semantics<arbitrary>], iteration_bounds = array<i64: 2, 1>, scalar_prefetch = 0 : i64, scratch_operands = 0 : i64, tpu.core_type = #tpu.core_type<tc>, window_params = [{transform_indices = @transform_0, window_bounds = array<i64: 4, 2>}, {transform_indices = @transform_1, window_bounds = array<i64: 1, 4, 256>}, {transform_indices = @transform_2, window_bounds = array<i64: 1, 4, 256>}, {transform_indices = @transform_3, window_bounds = array<i64: 1, 4, 256>}, {pipeline_mode = #tpu.pipeline_mode<synchronous>, transform_indices = @transform_4, window_bounds = array<i64: 32, 8>}, {pipeline_mode = #tpu.pipeline_mode<synchronous>, transform_indices = @transform_5, window_bounds = array<i64: 32, 2>}, {pipeline_mode = #tpu.pipeline_mode<synchronous>, transform_indices = @transform_6, window_bounds = array<i64: 4, 32>}, {pipeline_mode = #tpu.pipeline_mode<synchronous>, transform_indices = @transform_7, window_bounds = array<i64: 4, 1>}, {transform_indices = @transform_8, window_bounds = array<i64: 1, 4, 256>}, {transform_indices = @transform_9, window_bounds = array<i64: 1, 1, 1>}]} {
    %c0 = arith.constant 0 : index
    %0 = arith.index_cast %arg0 : i32 to index
    %1 = memref.load %arg2[%c0, %0] : memref<4x2xf32, #tpu.memory_space<smem>>
    %c1 = arith.constant 1 : index
    %2 = arith.index_cast %arg0 : i32 to index
    %3 = memref.load %arg2[%c1, %2] : memref<4x2xf32, #tpu.memory_space<smem>>
    %c2 = arith.constant 2 : index
    %4 = arith.index_cast %arg0 : i32 to index
    %5 = memref.load %arg2[%c2, %4] : memref<4x2xf32, #tpu.memory_space<smem>>
    %c3 = arith.constant 3 : index
    %6 = arith.index_cast %arg0 : i32 to index
    %7 = memref.load %arg2[%c3, %6] : memref<4x2xf32, #tpu.memory_space<smem>>
    %c0_0 = arith.constant 0 : index
    %c0_1 = arith.constant 0 : index
    %c0_2 = arith.constant 0 : index
    %8 = vector.load %arg3[%c0_0, %c0_1, %c0_2] : memref<1x4x256xf32, #tpu.memory_space<vmem>>, vector<1x4x256xf32>
    %9 = vector.shape_cast %8 : vector<1x4x256xf32> to vector<4x256xf32>
    %c0_3 = arith.constant 0 : index
    %c0_4 = arith.constant 0 : index
    %c0_5 = arith.constant 0 : index
    %10 = vector.load %arg4[%c0_3, %c0_4, %c0_5] : memref<1x4x256xf32, #tpu.memory_space<vmem>>, vector<1x4x256xf32>
    %11 = vector.shape_cast %10 : vector<1x4x256xf32> to vector<4x256xf32>
    %c0_6 = arith.constant 0 : index
    %c0_7 = arith.constant 0 : index
    %c0_8 = arith.constant 0 : index
    %12 = vector.load %arg5[%c0_6, %c0_7, %c0_8] : memref<1x4x256xf32, #tpu.memory_space<vmem>>, vector<1x4x256xf32>
    %13 = vector.shape_cast %12 : vector<1x4x256xf32> to vector<4x256xf32>
    %14 = vector.broadcast %1 : f32 to vector<4x256xf32>
    %15 = arith.mulf %14, %9 : vector<4x256xf32>
    %16 = vector.broadcast %3 : f32 to vector<4x256xf32>
    %17 = arith.mulf %16, %11 : vector<4x256xf32>
    %18 = arith.addf %15, %17 : vector<4x256xf32>
    %19 = tpu.concatenate %18, %13 in 0 : vector<4x256xf32>, vector<4x256xf32> -> vector<8x256xf32>
    %c0_9 = arith.constant 0 : index
    %c0_10 = arith.constant 0 : index
    %20 = vector.load %arg6[%c0_9, %c0_10] : memref<32x8xf32, #tpu.memory_space<vmem>>, vector<32x8xf32>
    %cst = arith.constant dense<0.000000e+00> : vector<32x256xf32>
    %21 = tpu.matmul %20, %19, %cst {dimension_numbers = #tpu.dot_dimension_numbers<[1], [0], [0], [1], [0, 0, 1, 1], [], []>} : vector<32x8xf32>, vector<8x256xf32>, vector<32x256xf32> -> vector<32x256xf32>
    %c0_11 = arith.constant 0 : index
    %c0_12 = arith.constant 0 : index
    %22 = vector.load %arg7[%c0_11, %c0_12] : memref<32x2xf32, #tpu.memory_space<vmem>>, vector<32x1xf32>
    %c0_13 = arith.constant 0 : index
    %c1_14 = arith.constant 1 : index
    %23 = vector.load %arg7[%c0_13, %c1_14] : memref<32x2xf32, #tpu.memory_space<vmem>>, vector<32x1xf32>
    %24 = vector.broadcast %7 : f32 to vector<32x1xf32>
    %25 = arith.mulf %23, %24 : vector<32x1xf32>
    %26 = arith.addf %22, %25 : vector<32x1xf32>
    %27 = vector.broadcast %26 : vector<32x1xf32> to vector<32x256xf32>
    %28 = arith.addf %21, %27 : vector<32x256xf32>
    %cst_15 = arith.constant 0.000000e+00 : f32
    %29 = vector.broadcast %cst_15 : f32 to vector<32x256xf32>
    %30 = arith.subf %29, %28 : vector<32x256xf32>
    %31 = math.exp %30 : vector<32x256xf32>
    %cst_16 = arith.constant 1.000000e+00 : f32
    %32 = vector.broadcast %cst_16 : f32 to vector<32x256xf32>
    %33 = arith.addf %32, %31 : vector<32x256xf32>
    %34 = tpu.reciprocal %33 {approx = true} : vector<32x256xf32> -> vector<32x256xf32>
    %35 = arith.mulf %28, %34 : vector<32x256xf32>
    %c0_17 = arith.constant 0 : index
    %c0_18 = arith.constant 0 : index
    %36 = vector.load %arg8[%c0_17, %c0_18] : memref<4x32xf32, #tpu.memory_space<vmem>>, vector<4x32xf32>
    %cst_19 = arith.constant dense<0.000000e+00> : vector<4x256xf32>
    %37 = tpu.matmul %36, %35, %cst_19 {dimension_numbers = #tpu.dot_dimension_numbers<[1], [0], [0], [1], [0, 0, 1, 1], [], []>} : vector<4x32xf32>, vector<32x256xf32>, vector<4x256xf32> -> vector<4x256xf32>
    %c0_20 = arith.constant 0 : index
    %c0_21 = arith.constant 0 : index
    %38 = vector.load %arg9[%c0_20, %c0_21] : memref<4x1xf32, #tpu.memory_space<vmem>>, vector<4x1xf32>
    %39 = vector.broadcast %38 : vector<4x1xf32> to vector<4x256xf32>
    %40 = arith.addf %37, %39 : vector<4x256xf32>
    %c0_22 = arith.constant 0 : index
    %c0_23 = arith.constant 0 : index
    %c0_24 = arith.constant 0 : index
    %41 = vector.load %arg10[%c0_22, %c0_23, %c0_24] : memref<1x4x256xf32, #tpu.memory_space<vmem>>, vector<1x4x256xf32>
    %42 = vector.shape_cast %41 : vector<1x4x256xf32> to vector<4x256xf32>
    %43 = vector.shape_cast %40 : vector<4x256xf32> to vector<1x4x256xf32>
    tpu.vector_store %arg10[%c0_22, %c0_23, %c0_24], %43 {strides = array<i32>} : memref<1x4x256xf32, #tpu.memory_space<vmem>>, vector<1x4x256xf32>,
    %c0_i32 = arith.constant 0 : i32
    %44 = arith.cmpi eq, %arg1, %c0_i32 : i32
    %45 = arith.extui %44 : i1 to i32
    %c0_i32_25 = arith.constant 0 : i32
    %46 = arith.cmpi ne, %45, %c0_i32_25 : i32
    scf.if %46 {
      %cst_35 = arith.constant 0.000000e+00 : f32
      %62 = vector.broadcast %cst_35 : f32 to vector<1x1xf32>
      %c0_36 = arith.constant 0 : index
      %c0_37 = arith.constant 0 : index
      %c0_38 = arith.constant 0 : index
      %63 = vector.load %arg11[%c0_36, %c0_37, %c0_38] : memref<1x1x1xf32, #tpu.memory_space<vmem>>, vector<1x1x1xf32>
      %64 = vector.shape_cast %63 : vector<1x1x1xf32> to vector<1x1xf32>
      %65 = vector.shape_cast %62 : vector<1x1xf32> to vector<1x1x1xf32>
      tpu.vector_store %arg11[%c0_36, %c0_37, %c0_38], %65 {strides = array<i32>} : memref<1x1x1xf32, #tpu.memory_space<vmem>>, vector<1x1x1xf32>,
    } else {
    }
    %47 = arith.subf %40, %11 : vector<4x256xf32>
    %48 = arith.mulf %47, %47 : vector<4x256xf32>
    %cst_26 = arith.constant dense<0.000000e+00> : vector<4xf32>
    %49 = vector.multi_reduction <add>, %48, %cst_26 [1] : vector<4x256xf32> to vector<4xf32>
    %50 = vector.shape_cast %49 : vector<4xf32> to vector<4x1xf32>
    %cst_27 = arith.constant dense<0.000000e+00> : vector<1xf32>
    %51 = vector.multi_reduction <add>, %50, %cst_27 [0] : vector<4x1xf32> to vector<1xf32>
    %52 = vector.shape_cast %51 : vector<1xf32> to vector<1x1xf32>
    %c0_28 = arith.constant 0 : index
    %c0_29 = arith.constant 0 : index
    %c0_30 = arith.constant 0 : index
    %53 = vector.load %arg11[%c0_28, %c0_29, %c0_30] : memref<1x1x1xf32, #tpu.memory_space<vmem>>, vector<1x1x1xf32>
    %54 = vector.shape_cast %53 : vector<1x1x1xf32> to vector<1x1xf32>
    %cst_31 = arith.constant 9.765625E-4 : f32
    %55 = arith.mulf %5, %cst_31 : f32
    %56 = vector.broadcast %55 : f32 to vector<1x1xf32>
    %57 = arith.mulf %56, %52 : vector<1x1xf32>
    %58 = arith.addf %54, %57 : vector<1x1xf32>
    %c0_32 = arith.constant 0 : index
    %c0_33 = arith.constant 0 : index
    %c0_34 = arith.constant 0 : index
    %59 = vector.load %arg11[%c0_32, %c0_33, %c0_34] : memref<1x1x1xf32, #tpu.memory_space<vmem>>, vector<1x1x1xf32>
    %60 = vector.shape_cast %59 : vector<1x1x1xf32> to vector<1x1xf32>
    %61 = vector.shape_cast %58 : vector<1x1xf32> to vector<1x1x1xf32>
    tpu.vector_store %arg11[%c0_32, %c0_33, %c0_34], %61 {strides = array<i32>} : memref<1x1x1xf32, #tpu.memory_space<vmem>>, vector<1x1x1xf32>,
    return
  }
  func.func @transform_0(%arg0: i32, %arg1: i32) -> (i32, i32) {
    %c0_i32 = arith.constant 0 : i32
    %c0_i32_0 = arith.constant 0 : i32
    %c0_i32_1 = arith.constant 0 : i32
    return %c0_i32, %c0_i32_0 : i32, i32
  }
  func.func @transform_1(%arg0: i32, %arg1: i32) -> (i32, i32, i32) {
    %c0_i32 = arith.constant 0 : i32
    %c0_i32_0 = arith.constant 0 : i32
    return %arg0, %c0_i32, %arg1 : i32, i32, i32
  }
  func.func @transform_2(%arg0: i32, %arg1: i32) -> (i32, i32, i32) {
    %c0_i32 = arith.constant 0 : i32
    %c0_i32_0 = arith.constant 0 : i32
    return %arg0, %c0_i32, %arg1 : i32, i32, i32
  }
  func.func @transform_3(%arg0: i32, %arg1: i32) -> (i32, i32, i32) {
    %c0_i32 = arith.constant 0 : i32
    %c0_i32_0 = arith.constant 0 : i32
    return %arg0, %c0_i32, %arg1 : i32, i32, i32
  }
  func.func @transform_4(%arg0: i32, %arg1: i32) -> (i32, i32) {
    %c0_i32 = arith.constant 0 : i32
    %c0_i32_0 = arith.constant 0 : i32
    %c0_i32_1 = arith.constant 0 : i32
    return %c0_i32, %c0_i32_0 : i32, i32
  }
  func.func @transform_5(%arg0: i32, %arg1: i32) -> (i32, i32) {
    %c0_i32 = arith.constant 0 : i32
    %c0_i32_0 = arith.constant 0 : i32
    %c0_i32_1 = arith.constant 0 : i32
    return %c0_i32, %c0_i32_0 : i32, i32
  }
  func.func @transform_6(%arg0: i32, %arg1: i32) -> (i32, i32) {
    %c0_i32 = arith.constant 0 : i32
    %c0_i32_0 = arith.constant 0 : i32
    %c0_i32_1 = arith.constant 0 : i32
    return %c0_i32, %c0_i32_0 : i32, i32
  }
  func.func @transform_7(%arg0: i32, %arg1: i32) -> (i32, i32) {
    %c0_i32 = arith.constant 0 : i32
    %c0_i32_0 = arith.constant 0 : i32
    %c0_i32_1 = arith.constant 0 : i32
    return %c0_i32, %c0_i32_0 : i32, i32
  }
  func.func @transform_8(%arg0: i32, %arg1: i32) -> (i32, i32, i32) {
    %c0_i32 = arith.constant 0 : i32
    %c0_i32_0 = arith.constant 0 : i32
    return %arg0, %c0_i32, %arg1 : i32, i32, i32
  }
  func.func @transform_9(%arg0: i32, %arg1: i32) -> (i32, i32, i32) {
    %c0_i32 = arith.constant 0 : i32
    %c0_i32_0 = arith.constant 0 : i32
    %c0_i32_1 = arith.constant 0 : i32
    return %arg0, %c0_i32, %c0_i32_0 : i32, i32, i32
  }
}

</mosaic_0001>

<bundles_post_ra>
// kernel: tpu_custom_call.1
= control target key start
LH: loop header
LB: loop body
LE: loop exit
PB: predicated region body
PF: predicated region fallthrough
CT: control target
= control target key end

     0   :  { %s1498_s0 = inlined_call_operand.vmem [shape: f32[4,2], index: 0, kind: input, shape index: {}]   ;;  %s1499_s1 = inlined_call_operand.vmem [shape: f32[2,4,256], index: 1, kind: input, shape index: {}]   ;;  %s1500_s2 = inlined_call_operand.vmem [shape: f32[2,4,256], index: 2, kind: input, shape index: {}]   ;;  %s1501_s3 = inlined_call_operand.vmem [shape: f32[2,4,256], index: 3, kind: input, shape index: {}]   ;;  %s1502_s4 = inlined_call_operand.vmem [shape: f32[32,8], index: 4, kind: input, shape index: {}]   ;;  %s1503_s5 = inlined_call_operand.vmem [shape: f32[32,2], index: 5, kind: input, shape index: {}]   ;;  %s1504_s6 = inlined_call_operand.vmem [shape: f32[4,32], index: 6, kind: input, shape index: {}]   ;;  %s1505_s7 = inlined_call_operand.vmem [shape: f32[4,1], index: 7, kind: input, shape index: {}]   ;;  %s1506_s8 = inlined_call_operand.hbm [shape: f32[2,4,256], index: 8, kind: output, shape index: {0}]   ;;  %s1507_s9 = inlined_call_operand.vmem [shape: f32[2,1,1], index: 9, kind: output, shape index: {1}]  }
   0x1   :  { %1513 = sst [smem:[#allocation14_spill]] %s1498_s0 }
   0x2   :  { %1514 = sst [smem:[#allocation15_spill]] %s1507_s9 }
   0x3   :  { %15 = vsyncpa [#allocation4], 0 }
   0x4   :  { %16 = vsyncpa [#allocation3], 0 }
   0x5   :  { %18 = vsyncpa [#allocation3 + $0x1], 0  ;;  %s1282_s30 = smov 0   ;;  %s1284_s10 = smov 0  }
   0x6   :  { %s1286_s11 = smov 0   ;;  %s1288_s12 = smov 0  }
   0x7   :  { %s1290_s13 = smov 0   ;;  %s1292_s14 = smov 0  }
   0x8 LB: > { %1515 = sst [smem:[#allocation8_spill]] %s1205_s30  ;;  %s979_s15 = sadd.s32 4294967295, %s1225_s14   ;;  %s1225_s14 = sphi %s1292_s14, %s24_s14   ;;  %s1221_s13 = sphi %s1290_s13, %s1532_s13   ;;  %s1217_s12 = sphi %s1288_s12, %s1531_s12   ;;  %s1213_s11 = sphi %s1286_s11, %s1530_s11   ;;  %s1209_s10 = sphi %s1284_s10, %s1534_s10   ;;  %s1205_s30 = sphi %s1282_s30, %s1533_s30  }
   0x9   : > { %1516 = sst [smem:[#allocation9_spill]] %s1213_s11  ;;  %s980_s16 = sadd.s32 4294967294, %s1225_s14  }
   0xa   : > { %1517 = sst [smem:[#allocation10_spill]] %s1221_s13  ;;  %s36_s17 = sadd.s32 1, %s1221_s13 }
   0xb   : > { %s234_s18 = sadd.s32 1, %s1213_s11  ;;  %p38_p0 = scmp.ge.s32.totalorder %s36_s17, 2 }
   0xc   : > { %p244_p1 = scmp.ne.s32.totalorder %s1213_s11, %s1209_s10  ;;  %p245_p2 = scmp.eq.s32.totalorder %s979_s15, 1 }
   0xd   : > { %p250_p3 = scmp.ne.s32.totalorder %s1209_s10, %s1205_s30  ;;  %s1536_s17 = smov (%p38_p0, %s36_s17), 0 }
   0xe   : > { %1518 = sst [smem:[#allocation11_spill]] %s1536_s17  ;;  %p1322_p4 = por %p245_p2, %p244_p1 }
   0xf   : > { %p251_p5 = scmp.eq.s32.totalorder %s980_s16, 1  ;;  %s229_s20 = ssub.s32 %s1221_s13, %s1536_s17 }
  0x10   : > { %p981_p6 = scmp.ge.s32.totalorder %s1225_s14, 1  ;;  %p232_p7 = scmp.eq.s32.totalorder %s229_s20, 0 }
  0x11   : > { %p1329_p8 = por %p251_p5, %p250_p3  ;;  %p284_p9 = scmp.lt.s32.totalorder %s1225_s14, 3 }
  0x12   : > { %s1335_s22 = scalar_select %p232_p7, %s1213_s11, %s234_s18  }
  0x13   : > { %s1520_s21 = scalar_select %p1329_p8, 1, 0 }
  0x14   : > { %1522 = sst [smem:[#allocation13_spill]] %s1335_s22  ;;  %p1337_p10 = pnand %p981_p6, %p284_p9 }
  0x15   : > { %1521 = sst [smem:[#allocation12_spill]] %s1520_s21  ;;  %p1341_p11 = scmp.eq.s32.totalorder %s979_s15, 0 }
  0x16   : > { %s1525_s0 = sld [smem:[#allocation14_spill]]  ;;  %p1030_p12 = pneg %p1337_p10 }
  0x18   : > { %p1031_p13 = pnand %p1341_p11, %p1030_p12 }
  0x1a   : > { %p1130_p1 = pneg %p1031_p13 }
  0x1c   : > { %s297_s27 = sshll.u32 %s1525_s0, 4  ;;  %s298_s27 = int_to_ptr.vmem [resolvable:$true] %s297_s27 }
  0x1d   : > { %s1128_s28 = scalar_lea.vmem %s298_s27, 64  ;;  %p1136_p5 = scmp.lt.s32.totalorder %s298_s27, %s298_s27 }
  0x1e   : > { %p1129_p0 = scmp.ne.s32.totalorder %s298_s27, %s1128_s28  ;;  %p1137_p6 = scmp.lt.s32.totalorder %s1128_s28, %s1128_s28 }
  0x20   : > { %p1131_p2 = pnand %p1130_p1, %p1129_p0  ;;  %p1138_p7 = por %p1137_p6, %p1136_p5 }
  0x22   : > { %p1132_p3 = pneg %p1131_p2 }
  0x24   : > { %p1139_p9 = pnand %p1138_p7, %p1132_p3 }
  0x26   : > { %1142 = shalt.err (!%p1139_p9)
}
  0x27   : > { %s1227_s29 = smov [#allocation2]   ;;  %361 = sbr.rel (%p1337_p10) target bundleno = 736 (0x2e0), region = 52 }
  0x28   : > { %1033 = dma.vmem_to_smem (!%p1031_p13), %s298_s27, 64, %s1227_s29, [#allocation4]  }
  0x2e   : > { %1196 = dma.done.wait (%p1341_p11), [#allocation4], 64  }
  0x2f   : > { %1198 = vsyncadd (%p1341_p11), [#allocation4], 4294967232 }
  0x30   : > { %367 = sfence }
  0x31   : > { %s458_s15 = sshra.s32 %s1217_s12, 7  ;;  %s1360_s16 = sand.u32 127, %s1217_s12  ;;  %v1228_v0 = vmov 0.0   ;;  %v1229_v1 = vmov 0   ;;  %vm785_vm0 = vcmask 0   ;;  %v497_v2 = vld [vmem:[%s1503_s5 + $0x10] sm:$0xff] }
  0x32   : > { %s1362_s18 = sshll.u32 %s458_s15, 7  ;;  %p424_p10 = scmp.lt.s32.totalorder %s1217_s12, 1  ;;  %621 = vmatprep.mubr.f32.mxu0 %v1228_v0  ;;  %769 = vmatprep.mubr.f32.mxu1 %v1228_v0  ;;  %v495_v3 = vld [vmem:[%s1503_s5] sm:$0xff]  ;;  %v498_v5 = vld [vmem:[%s1503_s5 + $0x18] sm:$0xff]  ;;  %v496_v6 = vld [vmem:[%s1503_s5 + $0x8] sm:$0xff]  ;;  %vm488_vm1 = vcmask 1043456  }
  0x33   : > { %s1014_s20 = sadd.s32 384, %s1362_s18  ;;  %s1368_s24 = sld [smem:[#allocation2 + %s1217_s12]]  ;;  %1093 = vset.pattern.permute.xlu0 %v1229_v1  ;;  %1094 = vset.pattern.permute.xlu1 %v1229_v1  ;;  %v491_v23 = vld [vmem:[%s1502_s4] sm:$0xff]  ;;  %vm544_vm2 = vcmask 64512   ;;  %v492_v24 = vld [vmem:[%s1502_s4 + $0x8] sm:$0xff]  ;;  %v493_v25 = vld [vmem:[%s1502_s4 + $0x10] sm:$0xff] }
  0x34   : > { %s472_s23 = sadd.s32 %s1014_s20, %s1360_s16  ;;  %s1010_s26 = sadd.s32 128, %s1362_s18  ;;  %v494_v26 = vld [vmem:[%s1502_s4 + $0x18] sm:$0xff]  ;;  %v695_v35 = vld [vmem:[%s1505_s7] sm:$0xf]  ;;  %vm701_vm3 = vcmask 261120  }
  0x35   : > { %s473_s25 = sld [smem:[#allocation2 + %s472_s23]]  ;;  %s464_s28 = sadd.s32 %s1010_s26, %s1360_s16 }
  0x36   : > { %s425_s27 = scalar_select %p424_p10, %s1217_s12, 1 }
  0x37   : > { %s1526_s9 = sld [smem:[#allocation15_spill]]  ;;  %s415_s11 = sand.u32 1, %s1209_s10  }
  0x38   : > { %s1006_s29 = sshll.u32 %s425_s27, 3  ;;  %s465_s30 = sld [smem:[#allocation2 + %s464_s28]] }
  0x39   : > { %s431_s26 = scalar_lea.vmem %s1499_s1, %s1006_s29  ;;  %s441_s20 = scalar_lea.vmem %s1500_s2, %s1006_s29  ;;  %v477_v10 = vstv %s1368_s24 }
  0x3a   : > { %s451_s23 = scalar_lea.vmem %s1501_s3, %s1006_s29  ;;  %v474_v9 = vld [vmem:[%s431_s26] sm:$0xff]  ;;  %s986_s21 = sshll.u32 %s415_s11, 3 }
  0x3b   : > { %v499_v4 = vstv %s473_s25  ;;  %s1230_s25 = smov 127   ;;  %v1402_v13 = vld [vmem:[%s441_s20] sm:$0xff]  ;;  %v478_v15 = vmul.f32 %v477_v10, %v474_v9  ;;  %s814_s29 = scalar_lea.sflag [#allocation3], %s415_s11 }
  0x3c   : > { %v502_v7 = vmul.f32 %v499_v4, %v497_v2  ;;  %v500_v8 = vmul.f32 %v499_v4, %v495_v3  ;;  %v503_v11 = vmul.f32 %v499_v4, %v498_v5  ;;  %v501_v12 = vmul.f32 %v499_v4, %v496_v6  ;;  %v476_v14 = vld [vmem:[%s451_s23] sm:$0xff]  ;;  %s417_s23 = scalar_lea.vmem [#allocation5], %s986_s21  ;;  %s1231_s0 = smov [#allocation5]  }
  0x3d   : > { %s1376_s17 = scalar_lea.vmem %s1526_s9, %s425_s27  ;;  %v486_v18 = vcombine.low %v476_v14, %v476_v14  ;;  %s833_s28 = sshll.u32 %s417_s23, 4  ;;  %s834_s28 = int_to_ptr.vmem [resolvable:$true] %s833_s28 }
  0x3e   : > { %786 = vst.msk [vmem:[%s1376_s17] sm:$0x1] %vm785_vm0, %v1228_v0  ;;  %512 = vrot.lane.b32.xlu1 %v502_v7, %s1230_s25  ;;  %508 = vrot.lane.b32.xlu0 %v500_v8, %s1230_s25  ;;  %v479_v16 = vstv %s465_s30  ;;  %s1143_s26 = scalar_lea.vmem %s834_s28, 128  ;;  %s1147_s27 = sshll.u32 %s1231_s0, 4  ;;  %s1148_s27 = int_to_ptr.vmem [resolvable:$false] %s1147_s27 }
  0x3f   : > { %v480_v17 = vmul.f32 %v479_v16, %v1402_v13  ;;  %p1144_p11 = scmp.ne.s32.totalorder %s834_s28, %s1143_s26  ;;  %s1149_s15 = scalar_lea.vmem %s1148_s27, 256 }
  0x40   : > { %p1150_p0 = scmp.lt.s32.totalorder %s834_s28, %s1148_s27  ;;  %p1151_p1 = scmp.lt.s32.totalorder %s1149_s15, %s1143_s26 }
  0x41   : > { %v481_v19 = vadd.f32 %v480_v17, %v478_v15  ;;  %p1145_p12 = pnand %p1144_p11, %p1322_p4 }
  0x42   : > { %514 = vrot.lane.b32.xlu1 %v503_v11, %s1230_s25  ;;  %510 = vrot.lane.b32.xlu0 %v501_v12, %s1230_s25  ;;  %s1015_s25 = sshll.u32 %s1217_s12, 7  ;;  %p1152_p2 = por %p1151_p1, %p1150_p0 }
  0x43   : > { %v483_v20 = vcombine.high %v481_v19, %v481_v19  ;;  %v489_v21 = vsel %vm488_vm1, %v481_v19, %v486_v18  ;;  %s1451_s30 = scalar_lea.hbm %s1506_s8, %s1015_s25  ;;  %p1146_p13 = pneg %p1145_p12 }
  0x45   : > { %v490_v22 = vsel %vm488_vm1, %v483_v20, %v476_v14  ;;  %p1153_p3 = pnand %p1152_p2, %p1146_p13 }
  0x46   : > { %557 = vmatprep.subr.mxu0 %v490_v22 }
  0x47   : > { %558 = vmatpush1.msra.mxu0 %v489_v21 }
  0x48   : > { %996 = vmatmul.mubr.msk.f32.vlgmr.msra.gmra.mrb[0].mxu0 %vm544_vm2, %v491_v23 }
  0x49   : > { %627 = vmatprep.mubr.f32.mxu0 %v1228_v0 }
  0x4c   : > { %997 = vmatmul.mubr.msk.f32.gmra.mrb[2].mxu0 %vm544_vm2, %v492_v24 }
  0x4d   : > { %633 = vmatprep.mubr.f32.mxu0 %v1228_v0 }
  0x50   : > { %998 = vmatmul.mubr.msk.f32.gmra.mrb[4].mxu0 %vm544_vm2, %v493_v25 }
  0x51   : > { %639 = vmatprep.mubr.f32.mxu0 %v1228_v0 }
  0x54   : > { %999 = vmatmul.mubr.msk.f32.gmra.mrb[6].mxu0 %vm544_vm2, %v494_v26 }
  0xb0   : > { %v513_v27 = vpop.permute.xlu1 %512  ;;  %v509_v28 = vpop.permute.xlu0 %508 }
  0xb1   : > { %v520_v29 = vadd.f32 %v509_v28, %v495_v3  ;;  %v522_v34 = vadd.f32 %v513_v27, %v497_v2 }
  0xb3   : > { %526 = vperm.xlu0 %1093, %v520_v29  }
  0xb4   : > { %v515_v30 = vpop.permute.xlu1 %514  ;;  %v511_v31 = vpop.permute.xlu0 %510 }
  0xb5   : > { %v523_v32 = vadd.f32 %v515_v30, %v498_v5  ;;  %v521_v33 = vadd.f32 %v511_v31, %v496_v6 }
  0xb7   : > { %541 = vperm.xlu0 %1093, %v523_v32   ;;  %531 = vperm.xlu1 %1094, %v521_v33  }
  0xbb   : > { %536 = vperm.xlu1 %1094, %v522_v34  }
  0xbf   : > { %698 = vperm.xlu1 %1094, %v695_v35  }
 0x11b   : > { %v623_v36 = vpop.f32.mrb[0].mxu0 }
 0x11c   : > { %v625_v37 = vpop.f32.mrb[1].mxu0 }
 0x11f   : > { %v629_v38 = vpop.f32.mrb[2].mxu0 }
 0x120   : > { %v631_v39 = vpop.f32.mrb[3].mxu0 }
 0x123   : > { %v635_v40 = vpop.f32.mrb[4].mxu0 }
 0x124   : > { %v637_v41 = vpop.f32.mrb[5].mxu0 }
 0x127   : > { %v641_v42 = vpop.f32.mrb[6].mxu0 }
 0x128   : > { %v643_v43 = vpop.f32.mrb[7].mxu0 }
 0x132   : > { %v527_v44 = vpop.permute.xlu0 %526 }
 0x133   : > { %v1422_v45 = vadd.f32 %v623_v36, %v527_v44  ;;  %v1424_v46 = vadd.f32 %v625_v37, %v527_v44 }
 0x135   : > { %v646_v47 = vsub.f32 0.0, %v1422_v45  ;;  %v647_v48 = vsub.f32 0.0, %v1424_v46 }
 0x136   : > { %v532_v49 = vpop.permute.xlu1 %531  ;;  %v542_v50 = vpop.permute.xlu0 %541 }
 0x137   : > { %v654_v51 = vmul.f32 1.442695, %v646_v47  ;;  %v656_v52 = vmul.f32 1.442695, %v647_v48  ;;  %v630_v53 = vadd.f32 %v629_v38, %v532_v49  ;;  %v632_v54 = vadd.f32 %v631_v39, %v532_v49 }
 0x138   : > { %v1428_v55 = vadd.f32 %v641_v42, %v542_v50  ;;  %v1430_v56 = vadd.f32 %v643_v43, %v542_v50  ;;  %v788_v48 = vcombine.high %v1402_v13, %v1402_v13 }
 0x139   : > { %1096 = vpow2.f32 %v654_v51  ;;  %v648_v57 = vsub.f32 0.0, %v630_v53  ;;  %v649_v58 = vsub.f32 0.0, %v632_v54 }
 0x13a   : > { %1098 = vpow2.f32 %v656_v52  ;;  %v652_v59 = vsub.f32 0.0, %v1428_v55  ;;  %v653_v60 = vsub.f32 0.0, %v1430_v56  ;;  %v537_v61 = vpop.permute.xlu1 %536 }
 0x13b   : > { %v658_v62 = vmul.f32 1.442695, %v648_v57  ;;  %v660_v63 = vmul.f32 1.442695, %v649_v58  ;;  %v636_v0 = vadd.f32 %v635_v40, %v537_v61  ;;  %v638_v1 = vadd.f32 %v637_v41, %v537_v61 }
 0x13c   : > { %v666_v2 = vmul.f32 1.442695, %v652_v59  ;;  %v668_v3 = vmul.f32 1.442695, %v653_v60 }
 0x13d   : > { %1100 = vpow2.f32 %v658_v62  ;;  %v650_v4 = vsub.f32 0.0, %v636_v0  ;;  %v651_v5 = vsub.f32 0.0, %v638_v1 }
 0x13e   : > { %1102 = vpow2.f32 %v660_v63 }
 0x13f   : > { %1104 = vpow2.f32 %v666_v2  ;;  %v662_v6 = vmul.f32 1.442695, %v650_v4  ;;  %v664_v7 = vmul.f32 1.442695, %v651_v5 }
 0x140   : > { %1106 = vpow2.f32 %v668_v3 }
 0x141   : > { %1108 = vpow2.f32 %v662_v6 }
 0x142   : > { %1110 = vpow2.f32 %v664_v7 }
 0x143   : > { %v1097_v8 = vpop.eup %1096 }
 0x144   : > { %v1099_v9 = vpop.eup %1098  ;;  %v670_v10 = vadd.f32 1.0, %v1097_v8 }
 0x145   : > { %v671_v11 = vadd.f32 1.0, %v1099_v9 }
 0x146   : > { %1112 = vrcp.f32 %v670_v10 }
 0x147   : > { %v1101_v12 = vpop.eup %1100  ;;  %1114 = vrcp.f32 %v671_v11 }
 0x148   : > { %v1103_v14 = vpop.eup %1102  ;;  %v672_v15 = vadd.f32 1.0, %v1101_v12 }
 0x149   : > { %v1105_v16 = vpop.eup %1104  ;;  %v673_v17 = vadd.f32 1.0, %v1103_v14 }
 0x14a   : > { %v1107_v18 = vpop.eup %1106  ;;  %1116 = vrcp.f32 %v672_v15  ;;  %v676_v19 = vadd.f32 1.0, %v1105_v16 }
 0x14b   : > { %v1109_v20 = vpop.eup %1108  ;;  %1118 = vrcp.f32 %v673_v17  ;;  %v677_v21 = vadd.f32 1.0, %v1107_v18 }
 0x14c   : > { %v1111_v22 = vpop.eup %1110  ;;  %1120 = vrcp.f32 %v676_v19  ;;  %v674_v23 = vadd.f32 1.0, %v1109_v20 }
 0x14d   : > { %1122 = vrcp.f32 %v677_v21  ;;  %v675_v24 = vadd.f32 1.0, %v1111_v22 }
 0x14e   : > { %1124 = vrcp.f32 %v674_v23 }
 0x14f   : > { %1126 = vrcp.f32 %v675_v24 }
 0x150   : > { %v1113_v25 = vpop.eup %1112 }
 0x151   : > { %v1115_v26 = vpop.eup %1114  ;;  %v686_v29 = vmul.f32 %v1113_v25, %v1422_v45  ;;  %v694_v45 = vld [vmem:[%s1504_s6] sm:$0xf] }
 0x152   : > { %v687_v32 = vmul.f32 %v1115_v26, %v1424_v46  ;;  %v699_v46 = vpop.permute.xlu1 %698 }
 0x154   : > { %v1117_v27 = vpop.eup %1116 }
 0x155   : > { %v1119_v28 = vpop.eup %1118  ;;  %v688_v30 = vmul.f32 %v1117_v27, %v630_v53 }
 0x156   : > { %v1121_v31 = vpop.eup %1120  ;;  %v689_v33 = vmul.f32 %v1119_v28, %v632_v54 }
 0x157   : > { %v1123_v34 = vpop.eup %1122  ;;  %v1018_v35 = vpack.c.bf16 %v688_v30, %v686_v29  ;;  %v692_v39 = vmul.f32 %v1121_v31, %v1428_v55 }
 0x158   : > { %v1125_v36 = vpop.eup %1124  ;;  %v1016_v37 = vpack.c.bf16 %v689_v33, %v687_v32  ;;  %v693_v41 = vmul.f32 %v1123_v34, %v1430_v56 }
 0x159   : > { %v1127_v38 = vpop.eup %1126  ;;  %v690_v40 = vmul.f32 %v1125_v36, %v636_v0 }
 0x15a   : > { %v691_v42 = vmul.f32 %v1127_v38, %v638_v1  ;;  %1017 = vmatprep.subr.bf16.mxu1 %v1016_v37 }
 0x15b   : > { %1019 = vmatpush1.bf16.msra.mxu1 %v1018_v35  ;;  %v1022_v43 = vpack.c.bf16 %v692_v39, %v690_v40 }
 0x15c   : > { %v1020_v44 = vpack.c.bf16 %v693_v41, %v691_v42 }
 0x15e   : > { %1021 = vmatprep.subr.bf16.mxu1 %v1020_v44 }
 0x15f   : > { %1023 = vmatpush1.bf16.msra.mxu1 %v1022_v43 }
 0x162   : > { %1000 = vmatmul.mubr.msk.f32.vlgmr.msra.gmra.mrb[0].mxu1 %vm701_vm3, %v694_v45 }
 0x235   : > { %v771_v47 = vpop.f32.mrb[0].mxu1 }
 0x236   : > { %v772_v49 = vadd.f32 %v771_v47, %v699_v46  ;;  %v773_v50 = vpop.f32.mrb[1].mxu1 }
 0x237   : > { %v774_v51 = vadd.f32 %v773_v50, %v699_v46 }
 0x238   : > { %v790_v52 = vsub.f32 %v772_v49, %v1402_v13 }
 0x239   : > { %v778_v53 = vcombine.low %v772_v49, %v774_v51  ;;  %v791_v54 = vsub.f32 %v774_v51, %v788_v48 }
 0x23a   : > { %v792_v55 = vmul.f32 %v790_v52, %v790_v52 }
 0x23b   : > { %v793_v56 = vmul.f32 %v791_v54, %v791_v54  ;;  %780 = vst [vmem:[%s417_s23] sm:$0xff] %v778_v53 }
 0x23c   : > { %v794_v57 = vsel %vm488_vm1, %v792_v55, 0.0 }
 0x23d   : > { %v795_v58 = vsel %vm488_vm1, %v793_v56, 0.0 }
 0x23e   : > { %v796_v59 = vadd.f32 %v795_v58, %v794_v57 }
 0x240   : > { %797 = vadd.xlane.f32.xlu0 %v796_v59 }
 0x241   : > { %1156 = shalt.err (!%p1153_p3)
}
 0x242   : > { %s1157_s12 = scalar_lea.hbm %s1451_s30, 128  ;;  %s1161_s20 = scalar_lea.hbm %s1506_s8, 256 }
 0x243   : > { %p1158_p5 = scmp.ne.s32.totalorder %s1451_s30, %s1157_s12  ;;  %p1162_p9 = scmp.lt.u32.totalorder %s1451_s30, %s1506_s8 }
 0x244   : > { %p1163_p10 = scmp.lt.u32.totalorder %s1161_s20, %s1157_s12  ;;  %p1165_p12 = scmp.lt.u32.totalorder %s1157_s12, %s1451_s30 }
 0x245   : > { %p1159_p6 = pnand %p1158_p5, %p1322_p4 }
 0x246   : > { %p1164_p11 = por %p1163_p10, %p1162_p9 }
 0x247   : > { %p1160_p7 = pneg %p1159_p6 }
 0x248   : > { %p1166_p13 = por %p1165_p12, %p1164_p11 }
 0x24a   : > { %p1167_p0 = pnand %p1166_p13, %p1160_p7 }
 0x24c   : > { %1170 = shalt.err (!%p1167_p0)
}
 0x24d   : > { %1028 = dma.vmem_to_hbm [thread:$0]  (%p1322_p4), %s834_s28, 128, %s1451_s30, %s814_s29   ;;  %v806_v4 = vld [vmem:[%s1376_s17] sm:$0x1] }
 0x24e   : > { %s1012_s23 = sadd.s32 256, %s1362_s18 }
 0x24f   : > { %s468_s25 = sadd.s32 %s1012_s23, %s1360_s16 }
 0x250   : > { %s469_s9 = sld [smem:[#allocation2 + %s468_s25]] }
 0x256   : > { %s807_s24 = smul.f32 0.0009765625, %s469_s9 }
 0x258   : > { %v808_v2 = vstv %s807_s24 }
 0x2cd   : > { %v798_v13 = vpop.xlane.xlu0 %797 }
 0x2ce   : > { %v799_v60 = vsel %vm488_vm1, %v798_v13, 0.0 }
 0x2cf   : > { %v800_v61 = vrot.slane %v799_v60, 4 }
 0x2d1   : > { %v801_v62 = vadd.f32 %v800_v61, %v799_v60 }
 0x2d3   : > { %v802_v63 = vrot.slane %v801_v62, 2 }
 0x2d5   : > { %v803_v0 = vadd.f32 %v802_v63, %v801_v62 }
 0x2d7   : > { %v804_v1 = vrot.slane %v803_v0, 1 }
 0x2d9   : > { %v805_v3 = vadd.f32 %v804_v1, %v803_v0 }
 0x2db   : > { %v809_v5 = vmul.f32 %v808_v2, %v805_v3 }
 0x2dd   : > { %v810_v6 = vadd.f32 %v809_v5, %v806_v4 }
 0x2df   : > { %812 = vst.msk [vmem:[%s1376_s17] sm:$0x1] %vm785_vm0, %v810_v6 }
 0x2e0 PF: > { %s1527_s19 = sld [smem:[#allocation8_spill]]  ;;  %p1040_p4 = scmp.ge.s32.totalorder %s1225_s14, 2 }
 0x2e2   : > { %p1035_p1 = pnand %p1040_p4, %p1329_p8 }
 0x2e6   : > { %s848_s18 = sand.u32 1, %s1527_s19  }
 0x2e7   : > { %s849_s30 = scalar_lea.sflag [#allocation3], %s848_s18 }
 0x2e8   : > { %1200 = dma.done.wait (!%p1035_p1), %s849_s30, 128  }
 0x2e9   : > { %1202 = vsyncadd (!%p1035_p1), %s849_s30, 4294967168  ;;  %s24_s14 = sadd.s32 1, %s1225_s14   ;;  %s1529_s28 = sld [smem:[#allocation9_spill]] }
 0x2ea   : > { %p21_p2 = scmp.ge.s32.totalorder %s24_s14, 4   ;;  %s1530_s11 = sld [smem:[#allocation13_spill]] }
 0x2eb   : > { %s1531_s12 = sld [smem:[#allocation10_spill]]  ;;  %s1532_s13 = sld [smem:[#allocation11_spill]] }
 0x2ec   : > { %s1533_s30 = smov %s1209_s10  ;;  %23 = sbr.rel (!%p21_p2) target bundleno = 8 (0x8), region = 114 }
 0x2ef   : > { %s1534_s10 = smov %s1529_s28 }
 0x2f3   :  { %860 = vsyncpa [#allocation3], 1 }
 0x2f4   :  { %862 = vsyncpa [#allocation3 + $0x1], 1 }
 0x2f5   :  { %863 = vsyncpa [#allocation4], 1 }
 0x2f6   :  { %865 = vsyncpa [#allocation4 + $0x1], 1 }

</bundles_post_ra>
